<compile_context>
chip_gen: v7x
topology: tpu7x:2x2x1
jax: 0.10.0
libtpu: 0.0.40
codegen_flags: <defaults>
</compile_context>

<pallas_src>
import functools
import math

import jax
import jax.numpy as jnp
from jax import lax
from jax.experimental import pallas as pl
from jax.experimental.pallas import tpu as pltpu

_EPS = 1e-7
_LANES = 128
_MAX_TN_FUSED = 8192      # anchors per grid step when DFL is fused in
_MAX_TN_IOU = 16384       # anchors per grid step for the IoU-only kernel
_IOU_CHUNK = 16           # sublane rows per IoU sub-chunk (falls back to 8)
_DFL_CHUNK = 512          # pd rows per DFL sub-chunk


def _round_up(x, m):
    return ((x + m - 1) // m) * m


def _choose_tiling(n, max_tn):
    """n_pad = round_up(n, 1024) first, then tn = a divisor of n_pad (<= cap): no padding
    inflation.  Prefer >= 2 grid steps (v7x has 2 TensorCores)."""
    n_pad = _round_up(n, 1024)
    k = n_pad // 1024
    max_k = max(1, max_tn // 1024)
    g_min = 2 if k >= 2 else 1
    for g in range(g_min, k + 1):
        if k % g == 0 and (k // g) <= max_k:
            return g, (k // g) * 1024
    return k, 1024  # TODO(synk): prime k > max_k degrades to 1024-anchor tiles


# --------------------------------------------------------------------------------------
# In-kernel math helpers
# --------------------------------------------------------------------------------------
def _rcp(x):
    # EUP approximate reciprocal + one Newton step: ~f32 accuracy, cheaper than a divide.
    r = pl.reciprocal(x, approx=True)
    return r * (2.0 - x * r)


_ATAN_COEFFS = (-0.3333314528, 0.1999355085, -0.1420889944, 0.1065626393,
                -0.0752896400, 0.0429096138, -0.0161657367, 0.0028662257)


def _atan(x):
    # arctan via odd minimax polynomial on [0,1] + pi/2 - atan(1/x) reduction (~2e-8 abs err).
    ax = jnp.abs(x)
    big = ax > 1.0
    z = jnp.minimum(ax, 1.0) * _rcp(jnp.maximum(ax, 1.0))
    z2 = z * z
    p = _ATAN_COEFFS[-1]
    for c in _ATAN_COEFFS[-2::-1]:
        p = p * z2 + c
    p = p * z2 + 1.0
    r = z * p
    r = jnp.where(big, (math.pi / 2.0) - r, r)
    return jnp.where(x < 0.0, -r, r)


def _fold_rows_to_8(x):
    # Fold (R,128) -> (8,128) with aligned sublane slices.
    while x.shape[0] > 8 and x.shape[0] % 16 == 0:
        h = x.shape[0] // 2
        x = x[:h] + x[h:]
    if x.shape[0] > 8:
        acc = x[:8]
        for k in range(1, x.shape[0] // 8):
            acc = acc + x[8 * k:8 * (k + 1)]
        x = acc
    return x


# --------------------------------------------------------------------------------------
# Per-tile partial sums
# --------------------------------------------------------------------------------------
def _iou_tile_partial(pb_ref, tb_ref, w_ref):
    """Partial sum of (1 - CIoU) * weight for this anchor tile as a lane-dense (8,128)."""
    f32 = jnp.float32
    tr = w_ref.shape[0]
    ch = _IOU_CHUNK if tr % _IOU_CHUNK == 0 else 8
    nchunks = tr // ch

    def body(c, acc):
        i0 = pl.multiple_of(c * ch, ch)
        sl = pl.ds(i0, ch)
        b1 = pb_ref[:, sl, :].astype(f32)           # (4, ch, 128) pred boxes (unscaled)
        b2 = tb_ref[:, sl, :].astype(f32)           # (4, ch, 128) target boxes (unscaled)
        w = w_ref[sl, :].astype(f32)                # (ch, 128) weight * fg mask

        b1x1, b1y1, b1x2, b1y2 = b1[0], b1[1], b1[2], b1[3]
        b2x1, b2y1, b2x2, b2y2 = b2[0], b2[1], b2[2], b2[3]

        inter = (jnp.maximum(jnp.minimum(b1x2, b2x2) - jnp.maximum(b1x1, b2x1), 0.0)
                 * jnp.maximum(jnp.minimum(b1y2, b2y2) - jnp.maximum(b1y1, b2y1), 0.0))
        w1 = b1x2 - b1x1
        h1 = b1y2 - b1y1 + _EPS
        w2 = b2x2 - b2x1
        h2 = b2y2 - b2y1 + _EPS
        union = w1 * h1 + w2 * h2 - inter + _EPS
        iou = inter * _rcp(union)

        cw = jnp.maximum(b1x2, b2x2) - jnp.minimum(b1x1, b2x1)
        chh = jnp.maximum(b1y2, b2y2) - jnp.minimum(b1y1, b2y1)
        c2 = cw * cw + chh * chh + _EPS
        rho2 = ((b2x1 + b2x2 - b1x1 - b1x2) ** 2
                + (b2y1 + b2y2 - b1y1 - b1y2) ** 2) * 0.25

        # CIoU is scale invariant -> stride dropped; arctan difference computed in-kernel.
        da = _atan(w2 * _rcp(h2)) - _atan(w1 * _rcp(h1))
        v = (4.0 / (math.pi ** 2)) * da * da
        alpha = v * _rcp(v - iou + (1.0 + _EPS))
        ciou = iou - (rho2 * _rcp(c2) + v * alpha)

        return acc + _fold_rows_to_8((1.0 - ciou) * w)

    return lax.fori_loop(0, nchunks, body, jnp.zeros((8, _LANES), f32), unroll=True)


def _dfl_tile_partial(pd_ref, tw_ref, reg_max):
    """Partial sum of DFL * weight / 4 for this tile, pred_dist in its natural layout:
    each 128-lane row holds (128 // reg_max) sides x reg_max bins."""
    f32 = jnp.float32
    rows = pd_ref.shape[0]
    spr = _LANES // reg_max                      # sides per pd row
    chd = _DFL_CHUNK if rows % _DFL_CHUNK == 0 else rows
    nchunks = rows // chd
    hi = lax.Precision.HIGHEST

    # Constants (iota-built 0/1 matrices; the MXU is otherwise idle).
    lane = lax.broadcasted_iota(jnp.int32, (chd, _LANES), 1)
    binf = (lane - (lane // reg_max) * reg_max).astype(f32)          # bin index within segment
    j2 = lax.broadcasted_iota(jnp.int32, (2 * spr, _LANES), 0)
    seg2 = lax.broadcasted_iota(jnp.int32, (2 * spr, _LANES), 1) // reg_max
    g_t = (j2 == seg2).astype(f32)               # expands packed targets to their bins
    g_w = (j2 == seg2 + spr).astype(f32)         # expands packed weights to their bins
    s1 = lax.broadcasted_iota(jnp.int32, (_LANES, _LANES), 0) // reg_max
    s2 = lax.broadcasted_iota(jnp.int32, (_LANES, _LANES), 1) // reg_max
    mseg = (s1 == s2).astype(f32)                # block-diag ones: per-segment sums
    inv_r = 1.0 / float(reg_max)

    def body(c, acc):
        i0 = pl.multiple_of(c * chd, chd)
        pd = pd_ref[pl.ds(i0, chd), :].astype(f32)     # (chd, 128) logits, natural layout
        tw = tw_ref[pl.ds(i0, chd), :].astype(f32)     # (chd, 2*spr) [targets | weights/4]
        t_b = jnp.dot(tw, g_t, preferred_element_type=f32, precision=hi)
        w_b = jnp.dot(tw, g_w, preferred_element_type=f32, precision=hi)
        # Log-softmax over each reg_max-wide lane segment.
        # TODO(synk): stabilised with the row max (8 segments); exact per-segment max would
        # only matter if logits within one row spanned > ~80, which detector heads never do.
        rmax = jnp.max(pd, axis=-1, keepdims=True)
        e = jnp.exp(pd - rmax)
        ssum = jnp.dot(e, mseg, preferred_element_type=f32, precision=hi)
        lse = jnp.log(ssum) + rmax
        # Hat function reproduces the two-sided CE interpolation weights (wl at tl, wr at tl+1).
        sel = jnp.maximum(1.0 - jnp.abs(binf - t_b), 0.0)
        contrib = (lse * inv_r - pd * sel) * w_b
        return acc + _fold_rows_to_8(contrib)

    return lax.fori_loop(0, nchunks, body, jnp.zeros((8, _LANES), f32))


# --------------------------------------------------------------------------------------
# Kernels
# --------------------------------------------------------------------------------------
def _iou_kernel(pb_ref, tb_ref, w_ref, iou_ref):
    iou_ref[0] = _iou_tile_partial(pb_ref, tb_ref, w_ref)


def _fused_kernel(reg_max, pb_ref, tb_ref, w_ref, pd_ref, tw_ref, iou_ref, dfl_ref):
    iou_ref[0] = _iou_tile_partial(pb_ref, tb_ref, w_ref)
    dfl_ref[0] = _dfl_tile_partial(pd_ref, tw_ref, reg_max)


# --------------------------------------------------------------------------------------
# pallas_call wrapper
# --------------------------------------------------------------------------------------
def _bbox_loss_pallas(pb_l, tb_l, w_l, dfl_args, *, tn, reg_max):
    nr = w_l.shape[0]
    tr = tn // _LANES
    g = nr // tr

    in_specs = [
        pl.BlockSpec((4, tr, _LANES), lambda i: (0, i, 0)),
        pl.BlockSpec((4, tr, _LANES), lambda i: (0, i, 0)),
        pl.BlockSpec((tr, _LANES), lambda i: (i, 0)),
    ]
    args = [pb_l, tb_l, w_l]
    compiler_params = pltpu.CompilerParams(
        dimension_semantics=("parallel",),            # lets megacore split the anchor tiles
        vmem_limit_bytes=32 * 1024 * 1024,
    )

    if dfl_args is None:
        out = pl.pallas_call(
            _iou_kernel,
            out_shape=jax.ShapeDtypeStruct((g, 8, _LANES), jnp.float32),
            grid_spec=pltpu.PrefetchScalarGridSpec(
                num_scalar_prefetch=0, grid=(g,),
                in_specs=in_specs,
                out_specs=pl.BlockSpec((1, 8, _LANES), lambda i: (i, 0, 0))),
            compiler_params=compiler_params,
        )(*args)
        return jnp.sum(out)

    pd_l, tw_l = dfl_args
    rd = pd_l.shape[0] // g
    spr2 = tw_l.shape[1]
    in_specs = in_specs + [
        pl.BlockSpec((rd, _LANES), lambda i: (i, 0)),
        pl.BlockSpec((rd, spr2), lambda i: (i, 0)),
    ]
    args = args + [pd_l, tw_l]
    out_iou, out_dfl = pl.pallas_call(
        functools.partial(_fused_kernel, reg_max),
        out_shape=(jax.ShapeDtypeStruct((g, 8, _LANES), jnp.float32),
                   jax.ShapeDtypeStruct((g, 8, _LANES), jnp.float32)),
        grid_spec=pltpu.PrefetchScalarGridSpec(
            num_scalar_prefetch=0, grid=(g,),
            in_specs=in_specs,
            out_specs=[pl.BlockSpec((1, 8, _LANES), lambda i: (i, 0, 0)),
                       pl.BlockSpec((1, 8, _LANES), lambda i: (i, 0, 0))]),
        compiler_params=compiler_params,
    )(*args)
    return jnp.sum(out_iou), jnp.sum(out_dfl)


# --------------------------------------------------------------------------------------
# BboxLoss module (JAX/Pallas re-implementation of models/yowo/loss.py::BboxLoss)
# --------------------------------------------------------------------------------------
class BboxLoss:
    def __init__(self, reg_max, use_dfl=False):
        self.reg_max = reg_max
        self.use_dfl = use_dfl

    def __call__(self, pred_dist, pred_bboxes, anchor_points, target_bboxes,
                 target_scores, target_scores_sum, fg_mask, stride_tensor,
                 img_size, iou_type='ciou'):
        # TODO(synk): only iou_type='ciou' (the YOWO default) is implemented; img_size and
        # stride_tensor are accepted but unused because CIoU is scale invariant.
        assert iou_type == 'ciou'
        f32 = jnp.float32
        B, A, C = target_scores.shape
        N = B * A

        max_tn = _MAX_TN_FUSED if self.use_dfl else _MAX_TN_IOU
        g, tn = _choose_tiling(N, max_tn)
        n_pad = g * tn
        pad = n_pad - N

        pb = pred_bboxes.reshape(N, 4)
        tb = target_bboxes.reshape(N, 4)
        # per-anchor weight with fg mask folded in (replaces masked_select and the (C,N) stream)
        w = (target_scores.astype(f32).sum(-1) * fg_mask.astype(f32)).reshape(N)

        def pad0(x):
            if pad == 0:
                return x
            return jnp.pad(x, ((0, pad),) + ((0, 0),) * (x.ndim - 1))

        nr = n_pad // _LANES
        pb_l = pad0(pb).T.reshape(4, nr, _LANES)       # coordinate planes, lane-dense
        tb_l = pad0(tb).T.reshape(4, nr, _LANES)
        w_l = pad0(w).reshape(nr, _LANES)

        dfl_args = None
        if self.use_dfl:
            R = self.reg_max
            assert _LANES % R == 0
            spr = _LANES // R
            ap = anchor_points.astype(f32).reshape(1, A, 2)
            x1y1 = target_bboxes[..., :2].astype(f32)
            x2y2 = target_bboxes[..., 2:].astype(f32)
            # bbox2dist (ultralytics-style; clamped so tl+1 stays inside the bins)
            ltrb = jnp.clip(jnp.concatenate([ap - x1y1, x2y2 - ap], axis=-1),
                            0.0, R - 1 - 0.01).reshape(N, 4)

            rd_total = n_pad * 4 // spr
            # pred_dist kept in its natural layout (pure reshape, no XLA transpose)
            pd_l = pad0(pred_dist.reshape(N, 4 * R)).reshape(rd_total, _LANES)
            t_side = pad0(ltrb).reshape(rd_total, spr)
            w_side = jnp.broadcast_to((pad0(w) * 0.25)[:, None],
                                      (n_pad, 4)).astype(f32).reshape(rd_total, spr)
            tw_l = jnp.concatenate([t_side, w_side], axis=-1)   # (rd_total, 2*spr)
            dfl_args = (pd_l, tw_l)

        if self.use_dfl:
            num_iou, num_dfl = _bbox_loss_pallas(pb_l, tb_l, w_l, dfl_args,
                                                 tn=tn, reg_max=self.reg_max)
            loss_iou = num_iou / target_scores_sum
            loss_dfl = num_dfl / target_scores_sum
        else:
            num_iou = _bbox_loss_pallas(pb_l, tb_l, w_l, None, tn=tn, reg_max=self.reg_max)
            loss_iou = num_iou / target_scores_sum
            loss_dfl = jnp.zeros((), f32)
        return loss_iou, loss_dfl


# --------------------------------------------------------------------------------------
# Pure-JAX reference (same math as the PyTorch module) for correctness checking
# --------------------------------------------------------------------------------------
def _reference(pred_dist, pred_bboxes, anchor_points, target_bboxes, target_scores,
               target_scores_sum, fg_mask, stride_tensor, reg_max, use_dfl):
    f32 = jnp.float32
    st = stride_tensor.astype(f32).reshape(1, -1, 1)
    b1 = pred_bboxes.astype(f32) * st
    b2 = target_bboxes.astype(f32) * st
    b1x1, b1y1, b1x2, b1y2 = [b1[..., i] for i in range(4)]
    b2x1, b2y1, b2x2, b2y2 = [b2[..., i] for i in range(4)]
    inter = (jnp.maximum(jnp.minimum(b1x2, b2x2) - jnp.maximum(b1x1, b2x1), 0.0) *
             jnp.maximum(jnp.minimum(b1y2, b2y2) - jnp.maximum(b1y1, b2y1), 0.0))
    w1, h1 = b1x2 - b1x1, b1y2 - b1y1 + _EPS
    w2, h2 = b2x2 - b2x1, b2y2 - b2y1 + _EPS
    union = w1 * h1 + w2 * h2 - inter + _EPS
    iou = inter / union
    cw = jnp.maximum(b1x2, b2x2) - jnp.minimum(b1x1, b2x1)
    ch = jnp.maximum(b1y2, b2y2) - jnp.minimum(b1y1, b2y1)
    c2 = cw * cw + ch * ch + _EPS
    rho2 = ((b2x1 + b2x2 - b1x1 - b1x2) ** 2 + (b2y1 + b2y2 - b1y1 - b1y2) ** 2) / 4.0
    v = (4.0 / (math.pi ** 2)) * (jnp.arctan(w2 / h2) - jnp.arctan(w1 / h1)) ** 2
    alpha = v / (v - iou + (1.0 + _EPS))
    ciou = iou - (rho2 / c2 + v * alpha)

    weight = target_scores.astype(f32).sum(-1)
    fg = fg_mask.astype(f32)
    loss_iou = ((1.0 - ciou) * weight * fg).sum() / target_scores_sum

    if not use_dfl:
        return loss_iou, jnp.zeros((), f32)

    R = reg_max
    ap = anchor_points.astype(f32).reshape(1, -1, 2)
    ltrb = jnp.clip(jnp.concatenate([ap - target_bboxes[..., :2],
                                     target_bboxes[..., 2:] - ap], -1), 0.0, R - 1 - 0.01)
    pd = pred_dist.astype(f32).reshape(*pred_dist.shape[:2], 4, R)
    tl = ltrb.astype(jnp.int32)
    wl = tl.astype(f32) + 1.0 - ltrb
    wr = 1.0 - wl
    logp = jax.nn.log_softmax(pd, axis=-1)
    ce_l = -jnp.take_along_axis(logp, tl[..., None], axis=-1)[..., 0]
    ce_r = -jnp.take_along_axis(logp, tl[..., None] + 1, axis=-1)[..., 0]
    dfl = (ce_l * wl + ce_r * wr).mean(-1)
    loss_dfl = (dfl * weight * fg).sum() / target_scores_sum
    return loss_iou, loss_dfl


# --------------------------------------------------------------------------------------
if __name__ == "__main__":
    key = jax.random.PRNGKey(0)
    C, R = 8, 16
    img_size = 224

    # Small single-tile case, a case that exercises the divisor-based padding (N=2400 ->
    # n_pad=3072, grid=3), and one that exercises multi-chunk / 4096-anchor tiles.
    for B, A in ((2, 192), (2, 1200), (2, 4096)):
        ks = jax.random.split(jax.random.fold_in(key, A), 8)

        anchor_points = jax.random.uniform(ks[0], (A, 2), minval=2.0, maxval=12.0)
        wh_t = jax.random.uniform(ks[1], (B, A, 2), minval=0.5, maxval=4.0)
        ctr_t = anchor_points[None] + jax.random.uniform(ks[2], (B, A, 2), minval=-1.0, maxval=1.0)
        target_bboxes = jnp.concatenate([ctr_t - wh_t / 2, ctr_t + wh_t / 2], axis=-1)
        wh_p = jax.random.uniform(ks[3], (B, A, 2), minval=0.5, maxval=4.0)
        ctr_p = anchor_points[None] + jax.random.uniform(ks[4], (B, A, 2), minval=-1.0, maxval=1.0)
        pred_bboxes = jnp.concatenate([ctr_p - wh_p / 2, ctr_p + wh_p / 2], axis=-1)

        pred_dist = jax.random.normal(ks[5], (B, A, 4 * R), dtype=jnp.float32)
        target_scores = jax.nn.sigmoid(jax.random.normal(ks[6], (B, A, C), dtype=jnp.float32))
        fg_mask = jax.random.bernoulli(ks[7], 0.3, (B, A))
        target_scores_sum = jnp.maximum(target_scores.sum(), 1.0)
        stride_tensor = jnp.concatenate([jnp.full((A // 2, 1), 8.0),
                                         jnp.full((A - A // 2, 1), 16.0)])

        for use_dfl in (False, True):
            module = BboxLoss(reg_max=R, use_dfl=use_dfl)
            loss_iou, loss_dfl = module(pred_dist, pred_bboxes, anchor_points, target_bboxes,
                                        target_scores, target_scores_sum, fg_mask,
                                        stride_tensor, img_size, iou_type='ciou')
            jax.block_until_ready((loss_iou, loss_dfl))
            ref_iou, ref_dfl = _reference(pred_dist, pred_bboxes, anchor_points, target_bboxes,
                                          target_scores, target_scores_sum, fg_mask,
                                          stride_tensor, R, use_dfl)
            assert jnp.allclose(loss_iou, ref_iou, rtol=1.5e-3, atol=1.5e-4), (loss_iou, ref_iou)
            assert jnp.allclose(loss_dfl, ref_dfl, rtol=1.5e-3, atol=1.5e-4), (loss_dfl, ref_dfl)

    print("KERNEL_OK")
</pallas_src>

<mosaic_0001>
module attributes {stable_mosaic.version = 11 : i64} {
  func.func @_iou_kernel(%arg0: i32, %arg1: memref<4x8x128xf32, #tpu.memory_space<vmem>>, %arg2: memref<4x8x128xf32, #tpu.memory_space<vmem>>, %arg3: memref<8x128xf32, #tpu.memory_space<vmem>>, %arg4: memref<1x8x128xf32, #tpu.memory_space<vmem>>) attributes {dimension_semantics = [#tpu.dimension_semantics<parallel>], iteration_bounds = array<i64: 1>, scalar_prefetch = 0 : i64, scratch_operands = 0 : i64, tpu.core_type = #tpu.core_type<tc>, window_params = [{transform_indices = @transform_0, window_bounds = array<i64: 4, 8, 128>}, {transform_indices = @transform_1, window_bounds = array<i64: 4, 8, 128>}, {transform_indices = @transform_2, window_bounds = array<i64: 8, 128>}, {transform_indices = @transform_3, window_bounds = array<i64: 1, 8, 128>}]} {
    %cst = arith.constant 0.000000e+00 : f32
    %0 = vector.broadcast %cst : f32 to vector<8x128xf32>
    %c0_i32 = arith.constant 0 : i32
    %c8_i32 = arith.constant 8 : i32
    %1 = arith.muli %c0_i32, %c8_i32 : i32
    %2 = tpu.assume_multiple %1, 8 : i32
    %c0 = arith.constant 0 : index
    %3 = arith.index_cast %2 : i32 to index
    %c0_0 = arith.constant 0 : index
    %4 = vector.load %arg1[%c0, %3, %c0_0] : memref<4x8x128xf32, #tpu.memory_space<vmem>>, vector<4x8x128xf32>
    %c0_1 = arith.constant 0 : index
    %5 = arith.index_cast %2 : i32 to index
    %c0_2 = arith.constant 0 : index
    %6 = vector.load %arg2[%c0_1, %5, %c0_2] : memref<4x8x128xf32, #tpu.memory_space<vmem>>, vector<4x8x128xf32>
    %7 = arith.index_cast %2 : i32 to index
    %c0_3 = arith.constant 0 : index
    %8 = vector.load %arg3[%7, %c0_3] : memref<8x128xf32, #tpu.memory_space<vmem>>, vector<8x128xf32>
    %9 = vector.extract_strided_slice %4 {offsets = [0, 0, 0], sizes = [1, 8, 128], strides = [1, 1, 1]} : vector<4x8x128xf32> to vector<1x8x128xf32>
    %10 = vector.shape_cast %9 : vector<1x8x128xf32> to vector<8x128xf32>
    %11 = vector.extract_strided_slice %4 {offsets = [1, 0, 0], sizes = [1, 8, 128], strides = [1, 1, 1]} : vector<4x8x128xf32> to vector<1x8x128xf32>
    %12 = vector.shape_cast %11 : vector<1x8x128xf32> to vector<8x128xf32>
    %13 = vector.extract_strided_slice %4 {offsets = [2, 0, 0], sizes = [1, 8, 128], strides = [1, 1, 1]} : vector<4x8x128xf32> to vector<1x8x128xf32>
    %14 = vector.shape_cast %13 : vector<1x8x128xf32> to vector<8x128xf32>
    %15 = vector.extract_strided_slice %4 {offsets = [3, 0, 0], sizes = [1, 8, 128], strides = [1, 1, 1]} : vector<4x8x128xf32> to vector<1x8x128xf32>
    %16 = vector.shape_cast %15 : vector<1x8x128xf32> to vector<8x128xf32>
    %17 = vector.extract_strided_slice %6 {offsets = [0, 0, 0], sizes = [1, 8, 128], strides = [1, 1, 1]} : vector<4x8x128xf32> to vector<1x8x128xf32>
    %18 = vector.shape_cast %17 : vector<1x8x128xf32> to vector<8x128xf32>
    %19 = vector.extract_strided_slice %6 {offsets = [1, 0, 0], sizes = [1, 8, 128], strides = [1, 1, 1]} : vector<4x8x128xf32> to vector<1x8x128xf32>
    %20 = vector.shape_cast %19 : vector<1x8x128xf32> to vector<8x128xf32>
    %21 = vector.extract_strided_slice %6 {offsets = [2, 0, 0], sizes = [1, 8, 128], strides = [1, 1, 1]} : vector<4x8x128xf32> to vector<1x8x128xf32>
    %22 = vector.shape_cast %21 : vector<1x8x128xf32> to vector<8x128xf32>
    %23 = vector.extract_strided_slice %6 {offsets = [3, 0, 0], sizes = [1, 8, 128], strides = [1, 1, 1]} : vector<4x8x128xf32> to vector<1x8x128xf32>
    %24 = vector.shape_cast %23 : vector<1x8x128xf32> to vector<8x128xf32>
    %25 = arith.minimumf %14, %22 : vector<8x128xf32>
    %26 = arith.maximumf %10, %18 : vector<8x128xf32>
    %27 = arith.subf %25, %26 : vector<8x128xf32>
    %cst_4 = arith.constant 0.000000e+00 : f32
    %28 = vector.broadcast %cst_4 : f32 to vector<8x128xf32>
    %29 = arith.maximumf %27, %28 : vector<8x128xf32>
    %30 = arith.minimumf %16, %24 : vector<8x128xf32>
    %31 = arith.maximumf %12, %20 : vector<8x128xf32>
    %32 = arith.subf %30, %31 : vector<8x128xf32>
    %cst_5 = arith.constant 0.000000e+00 : f32
    %33 = vector.broadcast %cst_5 : f32 to vector<8x128xf32>
    %34 = arith.maximumf %32, %33 : vector<8x128xf32>
    %35 = arith.mulf %29, %34 : vector<8x128xf32>
    %36 = arith.subf %14, %10 : vector<8x128xf32>
    %37 = arith.subf %16, %12 : vector<8x128xf32>
    %cst_6 = arith.constant 1.000000e-07 : f32
    %38 = vector.broadcast %cst_6 : f32 to vector<8x128xf32>
    %39 = arith.addf %37, %38 : vector<8x128xf32>
    %40 = arith.subf %22, %18 : vector<8x128xf32>
    %41 = arith.subf %24, %20 : vector<8x128xf32>
    %cst_7 = arith.constant 1.000000e-07 : f32
    %42 = vector.broadcast %cst_7 : f32 to vector<8x128xf32>
    %43 = arith.addf %41, %42 : vector<8x128xf32>
    %44 = arith.mulf %36, %39 : vector<8x128xf32>
    %45 = arith.mulf %40, %43 : vector<8x128xf32>
    %46 = arith.addf %44, %45 : vector<8x128xf32>
    %47 = arith.subf %46, %35 : vector<8x128xf32>
    %cst_8 = arith.constant 1.000000e-07 : f32
    %48 = vector.broadcast %cst_8 : f32 to vector<8x128xf32>
    %49 = arith.addf %47, %48 : vector<8x128xf32>
    %50 = tpu.reciprocal %49 {approx = true} : vector<8x128xf32> -> vector<8x128xf32>
    %51 = arith.mulf %49, %50 : vector<8x128xf32>
    %cst_9 = arith.constant 2.000000e+00 : f32
    %52 = vector.broadcast %cst_9 : f32 to vector<8x128xf32>
    %53 = arith.subf %52, %51 : vector<8x128xf32>
    %54 = arith.mulf %50, %53 : vector<8x128xf32>
    %55 = arith.mulf %35, %54 : vector<8x128xf32>
    %56 = arith.maximumf %14, %22 : vector<8x128xf32>
    %57 = arith.minimumf %10, %18 : vector<8x128xf32>
    %58 = arith.subf %56, %57 : vector<8x128xf32>
    %59 = arith.maximumf %16, %24 : vector<8x128xf32>
    %60 = arith.minimumf %12, %20 : vector<8x128xf32>
    %61 = arith.subf %59, %60 : vector<8x128xf32>
    %62 = arith.mulf %58, %58 : vector<8x128xf32>
    %63 = arith.mulf %61, %61 : vector<8x128xf32>
    %64 = arith.addf %62, %63 : vector<8x128xf32>
    %cst_10 = arith.constant 1.000000e-07 : f32
    %65 = vector.broadcast %cst_10 : f32 to vector<8x128xf32>
    %66 = arith.addf %64, %65 : vector<8x128xf32>
    %67 = arith.addf %18, %22 : vector<8x128xf32>
    %68 = arith.subf %67, %10 : vector<8x128xf32>
    %69 = arith.subf %68, %14 : vector<8x128xf32>
    %70 = arith.mulf %69, %69 : vector<8x128xf32>
    %71 = arith.addf %20, %24 : vector<8x128xf32>
    %72 = arith.subf %71, %12 : vector<8x128xf32>
    %73 = arith.subf %72, %16 : vector<8x128xf32>
    %74 = arith.mulf %73, %73 : vector<8x128xf32>
    %75 = arith.addf %70, %74 : vector<8x128xf32>
    %cst_11 = arith.constant 2.500000e-01 : f32
    %76 = vector.broadcast %cst_11 : f32 to vector<8x128xf32>
    %77 = arith.mulf %75, %76 : vector<8x128xf32>
    %78 = tpu.reciprocal %43 {approx = true} : vector<8x128xf32> -> vector<8x128xf32>
    %79 = arith.mulf %43, %78 : vector<8x128xf32>
    %cst_12 = arith.constant 2.000000e+00 : f32
    %80 = vector.broadcast %cst_12 : f32 to vector<8x128xf32>
    %81 = arith.subf %80, %79 : vector<8x128xf32>
    %82 = arith.mulf %78, %81 : vector<8x128xf32>
    %83 = arith.mulf %40, %82 : vector<8x128xf32>
    %84 = math.absf %83 : vector<8x128xf32>
    %cst_13 = arith.constant 1.000000e+00 : f32
    %85 = vector.broadcast %cst_13 : f32 to vector<8x128xf32>
    %86 = arith.cmpf ogt, %84, %85 : vector<8x128xf32>
    %cst_14 = arith.constant 1.000000e+00 : f32
    %87 = vector.broadcast %cst_14 : f32 to vector<8x128xf32>
    %88 = arith.minimumf %84, %87 : vector<8x128xf32>
    %cst_15 = arith.constant 1.000000e+00 : f32
    %89 = vector.broadcast %cst_15 : f32 to vector<8x128xf32>
    %90 = arith.maximumf %84, %89 : vector<8x128xf32>
    %91 = tpu.reciprocal %90 {approx = true} : vector<8x128xf32> -> vector<8x128xf32>
    %92 = arith.mulf %90, %91 : vector<8x128xf32>
    %cst_16 = arith.constant 2.000000e+00 : f32
    %93 = vector.broadcast %cst_16 : f32 to vector<8x128xf32>
    %94 = arith.subf %93, %92 : vector<8x128xf32>
    %95 = arith.mulf %91, %94 : vector<8x128xf32>
    %96 = arith.mulf %88, %95 : vector<8x128xf32>
    %97 = arith.mulf %96, %96 : vector<8x128xf32>
    %cst_17 = arith.constant 0.00286622578 : f32
    %98 = vector.broadcast %cst_17 : f32 to vector<8x128xf32>
    %99 = arith.mulf %98, %97 : vector<8x128xf32>
    %cst_18 = arith.constant -0.0161657371 : f32
    %100 = vector.broadcast %cst_18 : f32 to vector<8x128xf32>
    %101 = arith.addf %99, %100 : vector<8x128xf32>
    %102 = arith.mulf %101, %97 : vector<8x128xf32>
    %cst_19 = arith.constant 0.0429096147 : f32
    %103 = vector.broadcast %cst_19 : f32 to vector<8x128xf32>
    %104 = arith.addf %102, %103 : vector<8x128xf32>
    %105 = arith.mulf %104, %97 : vector<8x128xf32>
    %cst_20 = arith.constant -0.0752896368 : f32
    %106 = vector.broadcast %cst_20 : f32 to vector<8x128xf32>
    %107 = arith.addf %105, %106 : vector<8x128xf32>
    %108 = arith.mulf %107, %97 : vector<8x128xf32>
    %cst_21 = arith.constant 0.106562637 : f32
    %109 = vector.broadcast %cst_21 : f32 to vector<8x128xf32>
    %110 = arith.addf %108, %109 : vector<8x128xf32>
    %111 = arith.mulf %110, %97 : vector<8x128xf32>
    %cst_22 = arith.constant -1.420890e-01 : f32
    %112 = vector.broadcast %cst_22 : f32 to vector<8x128xf32>
    %113 = arith.addf %111, %112 : vector<8x128xf32>
    %114 = arith.mulf %113, %97 : vector<8x128xf32>
    %cst_23 = arith.constant 0.199935511 : f32
    %115 = vector.broadcast %cst_23 : f32 to vector<8x128xf32>
    %116 = arith.addf %114, %115 : vector<8x128xf32>
    %117 = arith.mulf %116, %97 : vector<8x128xf32>
    %cst_24 = arith.constant -0.333331466 : f32
    %118 = vector.broadcast %cst_24 : f32 to vector<8x128xf32>
    %119 = arith.addf %117, %118 : vector<8x128xf32>
    %120 = arith.mulf %119, %97 : vector<8x128xf32>
    %cst_25 = arith.constant 1.000000e+00 : f32
    %121 = vector.broadcast %cst_25 : f32 to vector<8x128xf32>
    %122 = arith.addf %120, %121 : vector<8x128xf32>
    %123 = arith.mulf %96, %122 : vector<8x128xf32>
    %cst_26 = arith.constant 1.57079637 : f32
    %124 = vector.broadcast %cst_26 : f32 to vector<8x128xf32>
    %125 = arith.subf %124, %123 : vector<8x128xf32>
    %126 = arith.select %86, %125, %123 : vector<8x128xi1>, vector<8x128xf32>
    %cst_27 = arith.constant 0.000000e+00 : f32
    %127 = vector.broadcast %cst_27 : f32 to vector<8x128xf32>
    %128 = arith.cmpf olt, %83, %127 : vector<8x128xf32>
    %cst_28 = arith.constant 0.000000e+00 : f32
    %129 = vector.broadcast %cst_28 : f32 to vector<8x128xf32>
    %130 = arith.subf %129, %126 : vector<8x128xf32>
    %131 = arith.select %128, %130, %126 : vector<8x128xi1>, vector<8x128xf32>
    %132 = tpu.reciprocal %39 {approx = true} : vector<8x128xf32> -> vector<8x128xf32>
    %133 = arith.mulf %39, %132 : vector<8x128xf32>
    %cst_29 = arith.constant 2.000000e+00 : f32
    %134 = vector.broadcast %cst_29 : f32 to vector<8x128xf32>
    %135 = arith.subf %134, %133 : vector<8x128xf32>
    %136 = arith.mulf %132, %135 : vector<8x128xf32>
    %137 = arith.mulf %36, %136 : vector<8x128xf32>
    %138 = math.absf %137 : vector<8x128xf32>
    %cst_30 = arith.constant 1.000000e+00 : f32
    %139 = vector.broadcast %cst_30 : f32 to vector<8x128xf32>
    %140 = arith.cmpf ogt, %138, %139 : vector<8x128xf32>
    %cst_31 = arith.constant 1.000000e+00 : f32
    %141 = vector.broadcast %cst_31 : f32 to vector<8x128xf32>
    %142 = arith.minimumf %138, %141 : vector<8x128xf32>
    %cst_32 = arith.constant 1.000000e+00 : f32
    %143 = vector.broadcast %cst_32 : f32 to vector<8x128xf32>
    %144 = arith.maximumf %138, %143 : vector<8x128xf32>
    %145 = tpu.reciprocal %144 {approx = true} : vector<8x128xf32> -> vector<8x128xf32>
    %146 = arith.mulf %144, %145 : vector<8x128xf32>
    %cst_33 = arith.constant 2.000000e+00 : f32
    %147 = vector.broadcast %cst_33 : f32 to vector<8x128xf32>
    %148 = arith.subf %147, %146 : vector<8x128xf32>
    %149 = arith.mulf %145, %148 : vector<8x128xf32>
    %150 = arith.mulf %142, %149 : vector<8x128xf32>
    %151 = arith.mulf %150, %150 : vector<8x128xf32>
    %cst_34 = arith.constant 0.00286622578 : f32
    %152 = vector.broadcast %cst_34 : f32 to vector<8x128xf32>
    %153 = arith.mulf %152, %151 : vector<8x128xf32>
    %cst_35 = arith.constant -0.0161657371 : f32
    %154 = vector.broadcast %cst_35 : f32 to vector<8x128xf32>
    %155 = arith.addf %153, %154 : vector<8x128xf32>
    %156 = arith.mulf %155, %151 : vector<8x128xf32>
    %cst_36 = arith.constant 0.0429096147 : f32
    %157 = vector.broadcast %cst_36 : f32 to vector<8x128xf32>
    %158 = arith.addf %156, %157 : vector<8x128xf32>
    %159 = arith.mulf %158, %151 : vector<8x128xf32>
    %cst_37 = arith.constant -0.0752896368 : f32
    %160 = vector.broadcast %cst_37 : f32 to vector<8x128xf32>
    %161 = arith.addf %159, %160 : vector<8x128xf32>
    %162 = arith.mulf %161, %151 : vector<8x128xf32>
    %cst_38 = arith.constant 0.106562637 : f32
    %163 = vector.broadcast %cst_38 : f32 to vector<8x128xf32>
    %164 = arith.addf %162, %163 : vector<8x128xf32>
    %165 = arith.mulf %164, %151 : vector<8x128xf32>
    %cst_39 = arith.constant -1.420890e-01 : f32
    %166 = vector.broadcast %cst_39 : f32 to vector<8x128xf32>
    %167 = arith.addf %165, %166 : vector<8x128xf32>
    %168 = arith.mulf %167, %151 : vector<8x128xf32>
    %cst_40 = arith.constant 0.199935511 : f32
    %169 = vector.broadcast %cst_40 : f32 to vector<8x128xf32>
    %170 = arith.addf %168, %169 : vector<8x128xf32>
    %171 = arith.mulf %170, %151 : vector<8x128xf32>
    %cst_41 = arith.constant -0.333331466 : f32
    %172 = vector.broadcast %cst_41 : f32 to vector<8x128xf32>
    %173 = arith.addf %171, %172 : vector<8x128xf32>
    %174 = arith.mulf %173, %151 : vector<8x128xf32>
    %cst_42 = arith.constant 1.000000e+00 : f32
    %175 = vector.broadcast %cst_42 : f32 to vector<8x128xf32>
    %176 = arith.addf %174, %175 : vector<8x128xf32>
    %177 = arith.mulf %150, %176 : vector<8x128xf32>
    %cst_43 = arith.constant 1.57079637 : f32
    %178 = vector.broadcast %cst_43 : f32 to vector<8x128xf32>
    %179 = arith.subf %178, %177 : vector<8x128xf32>
    %180 = arith.select %140, %179, %177 : vector<8x128xi1>, vector<8x128xf32>
    %cst_44 = arith.constant 0.000000e+00 : f32
    %181 = vector.broadcast %cst_44 : f32 to vector<8x128xf32>
    %182 = arith.cmpf olt, %137, %181 : vector<8x128xf32>
    %cst_45 = arith.constant 0.000000e+00 : f32
    %183 = vector.broadcast %cst_45 : f32 to vector<8x128xf32>
    %184 = arith.subf %183, %180 : vector<8x128xf32>
    %185 = arith.select %182, %184, %180 : vector<8x128xi1>, vector<8x128xf32>
    %186 = arith.subf %131, %185 : vector<8x128xf32>
    %cst_46 = arith.constant 0.405284733 : f32
    %187 = vector.broadcast %cst_46 : f32 to vector<8x128xf32>
    %188 = arith.mulf %187, %186 : vector<8x128xf32>
    %189 = arith.mulf %188, %186 : vector<8x128xf32>
    %190 = arith.subf %189, %55 : vector<8x128xf32>
    %cst_47 = arith.constant 1.00000012 : f32
    %191 = vector.broadcast %cst_47 : f32 to vector<8x128xf32>
    %192 = arith.addf %190, %191 : vector<8x128xf32>
    %193 = tpu.reciprocal %192 {approx = true} : vector<8x128xf32> -> vector<8x128xf32>
    %194 = arith.mulf %192, %193 : vector<8x128xf32>
    %cst_48 = arith.constant 2.000000e+00 : f32
    %195 = vector.broadcast %cst_48 : f32 to vector<8x128xf32>
    %196 = arith.subf %195, %194 : vector<8x128xf32>
    %197 = arith.mulf %193, %196 : vector<8x128xf32>
    %198 = arith.mulf %189, %197 : vector<8x128xf32>
    %199 = tpu.reciprocal %66 {approx = true} : vector<8x128xf32> -> vector<8x128xf32>
    %200 = arith.mulf %66, %199 : vector<8x128xf32>
    %cst_49 = arith.constant 2.000000e+00 : f32
    %201 = vector.broadcast %cst_49 : f32 to vector<8x128xf32>
    %202 = arith.subf %201, %200 : vector<8x128xf32>
    %203 = arith.mulf %199, %202 : vector<8x128xf32>
    %204 = arith.mulf %77, %203 : vector<8x128xf32>
    %205 = arith.mulf %189, %198 : vector<8x128xf32>
    %206 = arith.addf %204, %205 : vector<8x128xf32>
    %207 = arith.subf %55, %206 : vector<8x128xf32>
    %cst_50 = arith.constant 1.000000e+00 : f32
    %208 = vector.broadcast %cst_50 : f32 to vector<8x128xf32>
    %209 = arith.subf %208, %207 : vector<8x128xf32>
    %210 = arith.mulf %209, %8 : vector<8x128xf32>
    %211 = arith.addf %0, %210 : vector<8x128xf32>
    %c1_i32 = arith.constant 1 : i32
    %c0_51 = arith.constant 0 : index
    %c0_52 = arith.constant 0 : index
    %c0_53 = arith.constant 0 : index
    %212 = vector.load %arg4[%c0_51, %c0_52, %c0_53] : memref<1x8x128xf32, #tpu.memory_space<vmem>>, vector<1x8x128xf32>
    %213 = vector.shape_cast %212 : vector<1x8x128xf32> to vector<8x128xf32>
    %214 = vector.shape_cast %211 : vector<8x128xf32> to vector<1x8x128xf32>
    tpu.vector_store %arg4[%c0_51, %c0_52, %c0_53], %214 {strides = array<i32>} : memref<1x8x128xf32, #tpu.memory_space<vmem>>, vector<1x8x128xf32>,
    return
  }
  func.func @transform_0(%arg0: i32) -> (i32, i32, i32) {
    %c0_i32 = arith.constant 0 : i32
    %c0_i32_0 = arith.constant 0 : i32
    %c0_i32_1 = arith.constant 0 : i32
    return %c0_i32, %arg0, %c0_i32_0 : i32, i32, i32
  }
  func.func @transform_1(%arg0: i32) -> (i32, i32, i32) {
    %c0_i32 = arith.constant 0 : i32
    %c0_i32_0 = arith.constant 0 : i32
    %c0_i32_1 = arith.constant 0 : i32
    return %c0_i32, %arg0, %c0_i32_0 : i32, i32, i32
  }
  func.func @transform_2(%arg0: i32) -> (i32, i32) {
    %c0_i32 = arith.constant 0 : i32
    %c0_i32_0 = arith.constant 0 : i32
    return %arg0, %c0_i32 : i32, i32
  }
  func.func @transform_3(%arg0: i32) -> (i32, i32, i32) {
    %c0_i32 = arith.constant 0 : i32
    %c0_i32_0 = arith.constant 0 : i32
    %c0_i32_1 = arith.constant 0 : i32
    return %arg0, %c0_i32, %c0_i32_0 : i32, i32, i32
  }
}

</mosaic_0001>

<bundles_post_ra>
// kernel: tpu_custom_call.1
= control target key start
LH: loop header
LB: loop body
LE: loop exit
PB: predicated region body
PF: predicated region fallthrough
CT: control target
= control target key end

     0   :  { %8 = vsyncpa [#allocation3], 0  ;;  %s487_s0 = inlined_call_operand.hbm [shape: f32[4,8,128], index: 0, kind: input, shape index: {}]   ;;  %s488_s1 = inlined_call_operand.hbm [shape: f32[4,8,128], index: 1, kind: input, shape index: {}]   ;;  %s489_s2 = inlined_call_operand.hbm [shape: f32[8,128], index: 2, kind: input, shape index: {}]   ;;  %s490_s3 = inlined_call_operand.hbm [shape: f32[1,8,128], index: 3, kind: output, shape index: {}]  }
   0x1   :  { %9 = vsyncpa [#allocation6], 0 }
   0x2   :  { %10 = vsyncpa [#allocation4], 0  ;;  %s334_s12 = smov [#allocation5]   ;;  %s335_s14 = smov [#allocation2]  }
   0x3   :  { %s28_s13 = sshll.u32 %s334_s12, 4  ;;  %s16_s15 = sshll.u32 %s335_s14, 4  ;;  %s29_s13 = int_to_ptr.vmem [resolvable:$true] %s28_s13  ;;  %s360_s15 = int_to_ptr.vmem [resolvable:$true] %s16_s15 }
   0x4   :  { %s240_s18 = scalar_lea.hbm %s488_s1, 512 }
   0x5   :  { %p241_p0 = scmp.ne.s32.totalorder %s488_s1, %s240_s18  ;;  %p244_p1 = scmp.lt.u32.totalorder %s240_s18, %s488_s1 }
   0x7   :  { %p246_p2 = pnand %p244_p1, %p241_p0 }
   0x9   :  { %249 = shalt.err (!%p246_p2)
}
   0xa   :  { %s250_s23 = scalar_lea.vmem %s29_s13, 512  ;;  %p255_p4 = scmp.lt.s32.totalorder %s29_s13, %s29_s13 }
   0xb   :  { %p251_p3 = scmp.ne.s32.totalorder %s29_s13, %s250_s23  ;;  %p256_p5 = scmp.lt.s32.totalorder %s250_s23, %s250_s23 }
   0xd   :  { %p257_p6 = por %p256_p5, %p255_p4 }
   0xf   :  { %p258_p7 = pnand %p257_p6, %p251_p3 }
  0x11   :  { %261 = shalt.err (!%p258_p7)
}
  0x12   :  { %s336_s24 = smov 128   ;;  %s337_s25 = smov 8  }
  0x13   :  { %34 = dma.hbm_to_vmem [thread:$0]  %s488_s1, 512, %s29_s13, [#allocation6], %s336_s24, %s336_s24, %s337_s25  }
  0x14   :  { %s262_s30 = scalar_lea.hbm %s487_s0, 512 }
  0x15   :  { %p263_p8 = scmp.ne.s32.totalorder %s487_s0, %s262_s30  ;;  %p266_p9 = scmp.lt.u32.totalorder %s262_s30, %s487_s0 }
  0x17   :  { %p268_p10 = pnand %p266_p9, %p263_p8 }
  0x19   :  { %271 = shalt.err (!%p268_p10)
}
  0x1a   :  { %s272_s8 = scalar_lea.vmem %s360_s15, 512  ;;  %p277_p12 = scmp.lt.s32.totalorder %s360_s15, %s360_s15 }
  0x1b   :  { %p273_p11 = scmp.ne.s32.totalorder %s360_s15, %s272_s8  ;;  %p278_p13 = scmp.lt.s32.totalorder %s272_s8, %s272_s8 }
  0x1d   :  { %p279_p0 = por %p278_p13, %p277_p12 }
  0x1f   :  { %p280_p1 = pnand %p279_p0, %p273_p11 }
  0x21   :  { %283 = shalt.err (!%p280_p1)
}
  0x22   :  { %22 = dma.hbm_to_vmem [thread:$0]  %s487_s0, 512, %s360_s15, [#allocation3], %s336_s24, %s336_s24, %s337_s25  }
  0x23   :  { %s338_s10 = smov [#allocation7]   ;;  %s284_s14 = scalar_lea.hbm %s489_s2, 128 }
  0x24   :  { %s41_s11 = sshll.u32 %s338_s10, 4  ;;  %p285_p2 = scmp.ne.s32.totalorder %s489_s2, %s284_s14  ;;  %s42_s11 = int_to_ptr.vmem [resolvable:$true] %s41_s11 }
  0x25   :  { %p288_p3 = scmp.lt.u32.totalorder %s284_s14, %s489_s2 }
  0x27   :  { %p290_p4 = pnand %p288_p3, %p285_p2 }
  0x29   :  { %293 = shalt.err (!%p290_p4)
}
  0x2a   :  { %s294_s20 = scalar_lea.vmem %s42_s11, 128  ;;  %p299_p6 = scmp.lt.s32.totalorder %s42_s11, %s42_s11 }
  0x2b   :  { %p295_p5 = scmp.ne.s32.totalorder %s42_s11, %s294_s20  ;;  %p300_p7 = scmp.lt.s32.totalorder %s294_s20, %s294_s20 }
  0x2d   :  { %p301_p8 = por %p300_p7, %p299_p6 }
  0x2f   :  { %p302_p9 = pnand %p301_p8, %p295_p5 }
  0x31   :  { %305 = shalt.err (!%p302_p9)
}
  0x32   :  { %44 = dma.hbm_to_vmem [thread:$0]  %s489_s2, 128, %s42_s11, [#allocation6]  }
  0x33   :  { %328 = dma.done.wait [#allocation3], 512  }
  0x34   :  { %329 = vsyncadd [#allocation3], 4294966784 }
  0x35   :  { %330 = dma.done.wait [#allocation6], 640  }
  0x36   :  { %331 = vsyncadd [#allocation6], 4294966656  ;;  %v403_v0 = vld [vmem:[#allocation2] sm:$0xff]  ;;  %v405_v1 = vld [vmem:[#allocation2 + $0x8] sm:$0xff]  ;;  %s339_s2 = smov [#allocation8]  }
  0x37   :  { %v407_v2 = vld [vmem:[#allocation2 + $0x10] sm:$0xff]  ;;  %v409_v3 = vld [vmem:[#allocation2 + $0x18] sm:$0xff]  ;;  %v411_v4 = vld [vmem:[#allocation5] sm:$0xff]  ;;  %s210_s21 = sshll.u32 %s339_s2, 4  ;;  %s211_s21 = int_to_ptr.vmem [resolvable:$true] %s210_s21 }
  0x38   :  { %v413_v5 = vld [vmem:[#allocation5 + $0x8] sm:$0xff]  ;;  %v415_v6 = vld [vmem:[#allocation5 + $0x10] sm:$0xff]  ;;  %v417_v7 = vld [vmem:[#allocation5 + $0x18] sm:$0xff]  ;;  %v73_v8 = vsub.f32 %v409_v3, %v405_v1  ;;  %v89_v9 = vmin.f32 %v403_v0, %v411_v4  ;;  %v72_v10 = vsub.f32 %v407_v2, %v403_v0  ;;  %v64_v62 = vmax.f32 %v403_v0, %v411_v4  ;;  %s306_s22 = scalar_lea.vmem %s211_s21, 128  ;;  %p311_p11 = scmp.lt.s32.totalorder %s211_s21, %s211_s21 }
  0x39   :  { %v76_v11 = vsub.f32 %v417_v7, %v413_v5  ;;  %v88_v13 = vmax.f32 %v407_v2, %v415_v6  ;;  %v91_v14 = vmax.f32 %v409_v3, %v417_v7  ;;  %v92_v15 = vmin.f32 %v405_v1, %v413_v5  ;;  %p307_p10 = scmp.ne.s32.totalorder %s211_s21, %s306_s22  ;;  %p312_p12 = scmp.lt.s32.totalorder %s306_s22, %s306_s22 }
  0x3a   :  { %v74_v12 = vadd.f32 1e-07, %v73_v8  ;;  %v75_v16 = vsub.f32 %v415_v6, %v411_v4  ;;  %v98_v18 = vadd.f32 %v415_v6, %v411_v4  ;;  %v102_v22 = vadd.f32 %v417_v7, %v413_v5 }
  0x3b   :  { %v77_v17 = vadd.f32 1e-07, %v76_v11  ;;  %v90_v20 = vsub.f32 %v88_v13, %v89_v9  ;;  %v93_v21 = vsub.f32 %v91_v14, %v92_v15  ;;  %v63_v9 = vmin.f32 %v407_v2, %v415_v6  ;;  %p313_p13 = por %p312_p12, %p311_p11 }
  0x3c   :  { %v78_v19 = vmul.f32 %v74_v12, %v72_v10  ;;  %v99_v24 = vsub.f32 %v98_v18, %v403_v0  ;;  %v103_v27 = vsub.f32 %v102_v22, %v405_v1  ;;  %v68_v11 = vmax.f32 %v405_v1, %v413_v5 }
  0x3d   :  { %v79_v23 = vmul.f32 %v77_v17, %v75_v16  ;;  %v94_v25 = vmul.f32 %v90_v20, %v90_v20  ;;  %v95_v26 = vmul.f32 %v93_v21, %v93_v21  ;;  %226 = vrcp.f32 %v77_v17  ;;  %p314_p0 = pnand %p313_p13, %p307_p10 }
  0x3e   :  { %v100_v29 = vsub.f32 %v99_v24, %v407_v2  ;;  %228 = vrcp.f32 %v74_v12  ;;  %v104_v31 = vsub.f32 %v103_v27, %v409_v3 }
  0x3f   :  { %v441_v28 = vadd.f32 %v79_v23, %v78_v19  ;;  %v96_v30 = vadd.f32 %v95_v26, %v94_v25 }
  0x40   :  { %v101_v32 = vmul.f32 %v100_v29, %v100_v29  ;;  %v105_v34 = vmul.f32 %v104_v31, %v104_v31 }
  0x41   :  { %v97_v33 = vadd.f32 1e-07, %v96_v30 }
  0x42   :  { %v106_v35 = vadd.f32 %v105_v34, %v101_v32 }
  0x43   :  { %230 = vrcp.f32 %v97_v33 }
  0x44   :  { %v107_v48 = vmul.f32 0.25, %v106_v35 }
  0x47   :  { %v227_v36 = vpop.eup %226 }
  0x48   :  { %v229_v37 = vpop.eup %228  ;;  %v109_v38 = vmul.f32 %v227_v36, %v77_v17 }
  0x49   :  { %v146_v39 = vmul.f32 %v229_v37, %v74_v12 }
  0x4a   :  { %v110_v40 = vsub.f32 2.0, %v109_v38 }
  0x4b   :  { %v147_v41 = vsub.f32 2.0, %v146_v39 }
  0x4c   :  { %v111_v42 = vmul.f32 %v227_v36, %v110_v40 }
  0x4d   :  { %v231_v43 = vpop.eup %230  ;;  %v148_v44 = vmul.f32 %v229_v37, %v147_v41 }
  0x4e   :  { %v445_v45 = vmul.f32 %v111_v42, %v75_v16  ;;  %v193_v46 = vmul.f32 %v231_v43, %v97_v33  ;;  %v65_v16 = vsub.f32 %v63_v9, %v64_v62 }
  0x4f   :  { %v447_v47 = vmul.f32 %v148_v44, %v72_v10  ;;  %v67_v10 = vmin.f32 %v409_v3, %v417_v7 }
  0x50   :  { %v450_v49 = vand.u32 2147483647, %v445_v45  ;;  %v194_v50 = vsub.f32 2.0, %v193_v46  ;;  %v66_v20 = vmax.f32 %v65_v16, 0.0  ;;  %vm142_vm2 = vcmp.lt.f32.partialorder %v445_v45, 0.0 }
  0x51   :  { %v453_v51 = vand.u32 2147483647, %v447_v47  ;;  %v69_v17 = vsub.f32 %v67_v10, %v68_v11  ;;  %vm179_vm3 = vcmp.lt.f32.partialorder %v447_v47, 0.0 }
  0x52   :  { %v116_v52 = vmax.f32 %v450_v49, 1.0  ;;  %v195_v53 = vmul.f32 %v231_v43, %v194_v50  ;;  %v115_v60 = vmin.f32 %v450_v49, 1.0  ;;  %vm114_vm0 = vcmp.gt.f32.partialorder %v450_v49, 1.0 }
  0x53   :  { %v153_v54 = vmax.f32 %v453_v51, 1.0  ;;  %v152_v63 = vmin.f32 %v453_v51, 1.0  ;;  %v70_v21 = vmax.f32 %v69_v17, 0.0  ;;  %vm151_vm1 = vcmp.gt.f32.partialorder %v453_v51, 1.0 }
  0x54   :  { %232 = vrcp.f32 %v116_v52  ;;  %v457_v55 = vmul.f32 %v195_v53, %v107_v48 }
  0x55   :  { %234 = vrcp.f32 %v153_v54  ;;  %v71_v3 = vmul.f32 %v70_v21, %v66_v20  ;;  %v62_v20 = vld [vmem:[#allocation7] sm:$0xff] }
  0x57   :  { %v81_v25 = vsub.f32 %v441_v28, %v71_v3 }
  0x59   :  { %v82_v31 = vadd.f32 1e-07, %v81_v25 }
  0x5b   :  { %236 = vrcp.f32 %v82_v31 }
  0x5e   :  { %v233_v56 = vpop.eup %232 }
  0x5f   :  { %v235_v57 = vpop.eup %234  ;;  %v118_v58 = vmul.f32 %v233_v56, %v116_v52 }
  0x60   :  { %v155_v59 = vmul.f32 %v235_v57, %v153_v54 }
  0x61   :  { %v119_v61 = vsub.f32 2.0, %v118_v58 }
  0x62   :  { %v156_v8 = vsub.f32 2.0, %v155_v59 }
  0x63   :  { %v120_v12 = vmul.f32 %v233_v56, %v119_v61 }
  0x64   :  { %v157_v13 = vmul.f32 %v235_v57, %v156_v8 }
  0x65   :  { %v121_v14 = vmul.f32 %v120_v12, %v115_v60  ;;  %v237_v46 = vpop.eup %236 }
  0x66   :  { %v158_v15 = vmul.f32 %v157_v13, %v152_v63  ;;  %v84_v53 = vmul.f32 %v237_v46, %v82_v31 }
  0x67   :  { %v122_v18 = vmul.f32 %v121_v14, %v121_v14 }
  0x68   :  { %v159_v0 = vmul.f32 %v158_v15, %v158_v15  ;;  %v85_v59 = vsub.f32 2.0, %v84_v53 }
  0x69   :  { %v123_v4 = vmul.f32 0.0028662258, %v122_v18 }
  0x6a   :  { %v160_v19 = vmul.f32 0.0028662258, %v159_v0  ;;  %v86_v9 = vmul.f32 %v237_v46, %v85_v59 }
  0x6b   :  { %v124_v22 = vadd.f32 -0.016165737, %v123_v4 }
  0x6c   :  { %v161_v2 = vadd.f32 -0.016165737, %v160_v19  ;;  %v87_v13 = vmul.f32 %v86_v9, %v71_v3 }
  0x6d   :  { %v125_v6 = vmul.f32 %v124_v22, %v122_v18 }
  0x6e   :  { %v162_v23 = vmul.f32 %v161_v2, %v159_v0 }
  0x6f   :  { %v126_v7 = vadd.f32 0.042909615, %v125_v6 }
  0x70   :  { %v163_v24 = vadd.f32 0.042909615, %v162_v23 }
  0x71   :  { %v127_v1 = vmul.f32 %v126_v7, %v122_v18 }
  0x72   :  { %v164_v5 = vmul.f32 %v163_v24, %v159_v0 }
  0x73   :  { %v128_v26 = vadd.f32 -0.07528964, %v127_v1 }
  0x74   :  { %v165_v27 = vadd.f32 -0.07528964, %v164_v5 }
  0x75   :  { %v129_v29 = vmul.f32 %v128_v26, %v122_v18 }
  0x76   :  { %v166_v30 = vmul.f32 %v165_v27, %v159_v0 }
  0x77   :  { %v130_v32 = vadd.f32 0.10656264, %v129_v29 }
  0x78   :  { %v167_v33 = vadd.f32 0.10656264, %v166_v30 }
  0x79   :  { %v131_v34 = vmul.f32 %v130_v32, %v122_v18 }
  0x7a   :  { %v168_v35 = vmul.f32 %v167_v33, %v159_v0 }
  0x7b   :  { %v132_v36 = vadd.f32 -0.142089, %v131_v34 }
  0x7c   :  { %v169_v37 = vadd.f32 -0.142089, %v168_v35 }
  0x7d   :  { %v133_v38 = vmul.f32 %v132_v36, %v122_v18 }
  0x7e   :  { %v170_v39 = vmul.f32 %v169_v37, %v159_v0 }
  0x7f   :  { %v134_v40 = vadd.f32 0.19993551, %v133_v38 }
  0x80   :  { %v171_v41 = vadd.f32 0.19993551, %v170_v39 }
  0x81   :  { %v135_v42 = vmul.f32 %v134_v40, %v122_v18 }
  0x82   :  { %v172_v43 = vmul.f32 %v171_v41, %v159_v0 }
  0x83   :  { %v136_v44 = vadd.f32 -0.33333147, %v135_v42 }
  0x84   :  { %v173_v28 = vadd.f32 -0.33333147, %v172_v43 }
  0x85   :  { %v137_v48 = vmul.f32 %v136_v44, %v122_v18 }
  0x86   :  { %v174_v50 = vmul.f32 %v173_v28, %v159_v0 }
  0x87   :  { %v138_v52 = vadd.f32 1.0, %v137_v48 }
  0x88   :  { %v175_v54 = vadd.f32 1.0, %v174_v50 }
  0x89   :  { %v139_v56 = vmul.f32 %v138_v52, %v121_v14 }
  0x8a   :  { %v176_v57 = vmul.f32 %v175_v54, %v158_v15 }
  0x8b   :  { %v140_v58 = vsub.f32 1.5707964, %v139_v56 }
  0x8c   :  { %v177_v60 = vsub.f32 1.5707964, %v176_v57 }
  0x8d   :  { %v141_v61 = vsel %vm114_vm0, %v140_v58, %v139_v56 }
  0x8e   :  { %v143_v62 = vsub.f32 0.0, %v141_v61  ;;  %v178_v63 = vsel %vm151_vm1, %v177_v60, %v176_v57 }
  0x8f   :  { %v180_v8 = vsub.f32 0.0, %v178_v63 }
  0x90   :  { %v144_v10 = vsel %vm142_vm2, %v143_v62, %v141_v61 }
  0x91   :  { %v181_v11 = vsel %vm179_vm3, %v180_v8, %v178_v63 }
  0x92   :  { %v182_v12 = vsub.f32 %v144_v10, %v181_v11 }
  0x94   :  { %v183_v49 = vmul.f32 0.40528473, %v182_v12 }
  0x96   :  { %v184_v14 = vmul.f32 %v183_v49, %v182_v12 }
  0x98   :  { %v185_v15 = vsub.f32 %v184_v14, %v87_v13 }
  0x9a   :  { %v186_v16 = vadd.f32 1.0000001, %v185_v15 }
  0x9c   :  { %238 = vrcp.f32 %v186_v16 }
  0xa6   :  { %v239_v51 = vpop.eup %238 }
  0xa7   :  { %v188_v17 = vmul.f32 %v239_v51, %v186_v16 }
  0xa9   :  { %v189_v18 = vsub.f32 2.0, %v188_v17 }
  0xab   :  { %v190_v0 = vmul.f32 %v239_v51, %v189_v18 }
  0xad   :  { %v191_v45 = vmul.f32 %v190_v0, %v184_v14 }
  0xaf   :  { %v197_v4 = vmul.f32 %v191_v45, %v184_v14 }
  0xb1   :  { %v198_v19 = vadd.f32 %v197_v4, %v457_v55 }
  0xb3   :  { %v199_v47 = vsub.f32 %v87_v13, %v198_v19 }
  0xb5   :  { %v200_v21 = vsub.f32 1.0, %v199_v47 }
  0xb7   :  { %v201_v22 = vmul.f32 %v200_v21, %v62_v20 }
  0xb9   :  { %203 = vst [vmem:[#allocation8] sm:$0xff] %v201_v22 }
  0xba   :  { %317 = shalt.err (!%p314_p0)
}
  0xbb   :  { %s318_s25 = scalar_lea.hbm %s490_s3, 128 }
  0xbc   :  { %p319_p1 = scmp.ne.s32.totalorder %s490_s3, %s318_s25  ;;  %p322_p2 = scmp.lt.u32.totalorder %s318_s25, %s490_s3 }
  0xbe   :  { %p324_p3 = pnand %p322_p2, %p319_p1 }
  0xc0   :  { %327 = shalt.err (!%p324_p3)
}
  0xc1   :  { %213 = dma.vmem_to_hbm [thread:$0]  %s211_s21, 128, %s490_s3, [#allocation4]  }
  0xc2   :  { %332 = dma.done.wait [#allocation4], 128  }
  0xc3   :  { %333 = vsyncadd [#allocation4], 4294967168 }
  0xc4   :  { %217 = vsyncpa [#allocation3], 1 }
  0xc5   :  { %218 = vsyncpa [#allocation6], 1 }
  0xc6   :  { %219 = vsyncpa [#allocation4], 1 }

</bundles_post_ra>
